<compile_context>
chip_gen: v6e
topology: v6e:2x2x1
jax: 0.10.0
libtpu: 0.0.40
codegen_flags: <defaults>
</compile_context>

<pallas_src>
import jax
import jax.numpy as jnp
from jax.experimental import pallas as pl
from jax.experimental.pallas import tpu as pltpu


def _normalize_kernel(scale_ref, bias_ref, x_ref, o_ref):
    # scale/bias are (BR, 1) float32 columns; math in f32, cast on store.
    x = x_ref[...].astype(jnp.float32)
    o_ref[...] = (x * scale_ref[...] + bias_ref[...]).astype(o_ref.dtype)


def _target_bytes_and_vmem_limit():
    """Per-generation tile budget and scoped-VMEM limit (None = default)."""
    try:
        kind = jax.devices()[0].device_kind.lower()
    except Exception:
        kind = ""
    if "v7" in kind:
        # 4 tiles (x + out, double-buffered) * 7 MiB ~= 28 MiB < 48 MiB < 64 MiB phys.
        return 7 * 1024 * 1024, 48 * 1024 * 1024
    if "v6" in kind:
        # 4 * 4 MiB = 16 MiB of block buffers, well under 128 MiB physical VMEM.
        return 4 * 1024 * 1024, 64 * 1024 * 1024
    # v5e / unknown: 2 MiB tiles fit the 16 MiB default scoped-VMEM limit;
    # larger tiles buy ~nothing at ~0.82 TB/s.
    return 2 * 1024 * 1024, None


def _pick_block_shape(rows, lanes, itemsize, target_bytes, min_steps):
    """Choose a (BR, BL) block: lane-dense, contiguous-DMA-friendly, ~target_bytes."""
    sublane = {4: 8, 2: 16, 1: 32}.get(itemsize, 8)

    # Prefer full-width lane blocks (BL = lanes): each (BR, lanes) tile is one
    # contiguous HBM region. Only block the lane axis when even a single
    # 8-sublane stripe exceeds the budget.
    stripe_bytes = sublane * lanes * itemsize
    if stripe_bytes <= target_bytes:
        bl = lanes
    else:
        bl = max(128, (target_bytes // (sublane * itemsize)) // 128 * 128)
        bl = min(bl, lanes)

    # Rows: full extent if it fits the budget, otherwise a multiple of the
    # sublane tiling (final overhanging block is handled by Pallas).
    if rows * bl * itemsize <= target_bytes:
        br = rows
    else:
        br = max(sublane, (target_bytes // (bl * itemsize)) // sublane * sublane)
        br = min(br, rows)

    # Megacore: guarantee >= min_steps grid steps so v7x's two TensorCores
    # both get work (and DMA/compute pipelining exists). Shrink BR first so
    # lane blocks stay full width; fall back to splitting lanes.
    def _steps(br_, bl_):
        return pl.cdiv(rows, br_) * pl.cdiv(lanes, bl_)

    while _steps(br, bl) < min_steps and br > sublane:
        br = max(sublane, ((br // 2) // sublane) * sublane)
    while _steps(br, bl) < min_steps and bl > 128:
        bl = max(128, ((bl // 2) // 128) * 128)

    return br, bl


def normalize(x, mu, std):
    """(x - mu) / std with per-channel mu/std.

    x:   (N, C, H, W)
    mu:  (C,)
    std: (C,)
    """
    N, C, H, W = x.shape
    R = N * C          # one row per (n, c) plane
    L = H * W          # spatial dims flattened onto the lane axis

    x2 = x.reshape(R, L)

    # Pad the lane axis up to a multiple of 128 so output stores are unmasked
    # lane-dense vst (masked vst.msk is ~4.5x worse store overhead); the pad
    # is sliced off after the kernel.
    Lp = ((L + 127) // 128) * 128
    if Lp != L:
        x2 = jnp.pad(x2, ((0, 0), (0, Lp - L)))

    # Fold mu/std into per-row scale/bias column vectors, carried in float32
    # (R floats each — negligible bandwidth, recovers bf16/fp16 accuracy).
    inv_std = 1.0 / std.astype(jnp.float32)
    neg_mu_inv = -mu.astype(jnp.float32) * inv_std
    scale_row = jnp.tile(inv_std, N).reshape(R, 1)     # row n*C + c -> 1/std[c]
    bias_row = jnp.tile(neg_mu_inv, N).reshape(R, 1)   # row n*C + c -> -mu[c]/std[c]

    itemsize = jnp.dtype(x.dtype).itemsize
    target_bytes, vmem_limit = _target_bytes_and_vmem_limit()
    # Only force multi-step grids when there is enough data to split (~>1 MiB).
    min_steps = 4 if R * Lp * itemsize > (1 << 20) else 1
    BR, BL = _pick_block_shape(R, Lp, itemsize, target_bytes, min_steps)

    # Grid order: rows OUTER, lanes INNER (do not swap) — scale/bias blocks
    # depend only on i and stay resident across the inner lane loop.
    grid = (pl.cdiv(R, BR), pl.cdiv(Lp, BL))

    cp_kwargs = dict(dimension_semantics=("parallel", "parallel"))
    if vmem_limit is not None:
        cp_kwargs["vmem_limit_bytes"] = vmem_limit

    out = pl.pallas_call(
        _normalize_kernel,
        out_shape=jax.ShapeDtypeStruct((R, Lp), x.dtype),
        grid=grid,
        in_specs=[
            pl.BlockSpec((BR, 1), lambda i, j: (i, 0)),   # scale (R, 1) f32
            pl.BlockSpec((BR, 1), lambda i, j: (i, 0)),   # bias  (R, 1) f32
            pl.BlockSpec((BR, BL), lambda i, j: (i, j)),  # x     (R, Lp)
        ],
        out_specs=pl.BlockSpec((BR, BL), lambda i, j: (i, j)),
        compiler_params=pltpu.CompilerParams(**cp_kwargs),
    )(scale_row, bias_row, x2)

    if Lp != L:
        out = out[:, :L]
    return out.reshape(N, C, H, W)


if __name__ == "__main__":
    key = jax.random.PRNGKey(0)
    kx, kmu, kstd = jax.random.split(key, 3)

    N, C, H, W = 2, 4, 16, 16
    x = jax.random.normal(kx, (N, C, H, W), dtype=jnp.float32)
    mu = jax.random.normal(kmu, (C,), dtype=jnp.float32) * 0.1
    std = jax.random.uniform(kstd, (C,), dtype=jnp.float32, minval=0.5, maxval=1.5)

    y = normalize(x, mu, std)
    jax.block_until_ready(y)

    # Reference check against plain JAX (same semantics as the PyTorch module).
    # Note: x*(1/std) + (-mu/std) differs from (x-mu)/std only in rounding;
    # std == 0 propagates inf/nan exactly like the reference module.
    y_ref = (x - mu[None, :, None, None]) / std[None, :, None, None]
    assert y.shape == x.shape and y.dtype == x.dtype
    assert jnp.max(jnp.abs(y - y_ref)) < 1e-5

    print("KERNEL_OK")
</pallas_src>

<mosaic_0001>
module attributes {stable_mosaic.version = 11 : i64} {
  func.func @_normalize_kernel(%arg0: i32, %arg1: i32, %arg2: memref<8x1xf32, #tpu.memory_space<vmem>>, %arg3: memref<8x1xf32, #tpu.memory_space<vmem>>, %arg4: memref<8x256xf32, #tpu.memory_space<vmem>>, %arg5: memref<8x256xf32, #tpu.memory_space<vmem>>) attributes {dimension_semantics = [#tpu.dimension_semantics<parallel>, #tpu.dimension_semantics<parallel>], iteration_bounds = array<i64: 1, 1>, scalar_prefetch = 0 : i64, scratch_operands = 0 : i64, tpu.core_type = #tpu.core_type<tc>, window_params = [{transform_indices = @transform_0, window_bounds = array<i64: 8, 1>}, {transform_indices = @transform_1, window_bounds = array<i64: 8, 1>}, {transform_indices = @transform_2, window_bounds = array<i64: 8, 256>}, {transform_indices = @transform_3, window_bounds = array<i64: 8, 256>}]} {
    %c0 = arith.constant 0 : index
    %c0_0 = arith.constant 0 : index
    %0 = vector.load %arg4[%c0, %c0_0] : memref<8x256xf32, #tpu.memory_space<vmem>>, vector<8x256xf32>
    %c0_1 = arith.constant 0 : index
    %c0_2 = arith.constant 0 : index
    %1 = vector.load %arg2[%c0_1, %c0_2] : memref<8x1xf32, #tpu.memory_space<vmem>>, vector<8x1xf32>
    %2 = vector.broadcast %1 : vector<8x1xf32> to vector<8x256xf32>
    %3 = arith.mulf %0, %2 : vector<8x256xf32>
    %c0_3 = arith.constant 0 : index
    %c0_4 = arith.constant 0 : index
    %4 = vector.load %arg3[%c0_3, %c0_4] : memref<8x1xf32, #tpu.memory_space<vmem>>, vector<8x1xf32>
    %5 = vector.broadcast %4 : vector<8x1xf32> to vector<8x256xf32>
    %6 = arith.addf %3, %5 : vector<8x256xf32>
    %c0_5 = arith.constant 0 : index
    %c0_6 = arith.constant 0 : index
    %7 = vector.load %arg5[%c0_5, %c0_6] : memref<8x256xf32, #tpu.memory_space<vmem>>, vector<8x256xf32>
    tpu.vector_store %arg5[%c0_5, %c0_6], %6 {strides = array<i32>} : memref<8x256xf32, #tpu.memory_space<vmem>>, vector<8x256xf32>,
    return
  }
  func.func @transform_0(%arg0: i32, %arg1: i32) -> (i32, i32) {
    %c0_i32 = arith.constant 0 : i32
    %c0_i32_0 = arith.constant 0 : i32
    return %arg0, %c0_i32 : i32, i32
  }
  func.func @transform_1(%arg0: i32, %arg1: i32) -> (i32, i32) {
    %c0_i32 = arith.constant 0 : i32
    %c0_i32_0 = arith.constant 0 : i32
    return %arg0, %c0_i32 : i32, i32
  }
  func.func @transform_2(%arg0: i32, %arg1: i32) -> (i32, i32) {
    %c0_i32 = arith.constant 0 : i32
    return %arg0, %arg1 : i32, i32
  }
  func.func @transform_3(%arg0: i32, %arg1: i32) -> (i32, i32) {
    %c0_i32 = arith.constant 0 : i32
    return %arg0, %arg1 : i32, i32
  }
}

</mosaic_0001>

<bundles_post_ra>
// kernel: tpu_custom_call.1
= control target key start
LH: loop header
LB: loop body
LE: loop exit
PB: predicated region body
PF: predicated region fallthrough
CT: control target
= control target key end

     0   :  { %v74_v1 = vmov 0   ;;  %s111_s0 = inlined_call_operand.vmem [shape: f32[8,1], index: 0, kind: input, shape index: {}]   ;;  %s112_s1 = inlined_call_operand.vmem [shape: f32[8,1], index: 1, kind: input, shape index: {}]   ;;  %s113_s2 = inlined_call_operand.vmem [shape: f32[8,256], index: 2, kind: input, shape index: {}]   ;;  %s114_s3 = inlined_call_operand.hbm [shape: f32[8,256], index: 3, kind: output, shape index: {}]  }
   0x1   :  { %v17_v0 = vld [vmem:[%s111_s0] sm:$0xff]  ;;  %51 = vset.pattern.permute.xlu0 %v74_v1 }
   0x2   :  { %8 = vsyncpa [#allocation3], 0  ;;  %20 = vperm.xlu0 %51, %v17_v0   ;;  %v25_v2 = vld [vmem:[%s112_s1] sm:$0xff]  ;;  %v16_v5 = vld [vmem:[%s113_s2 + $0x8] sm:$0xff]  ;;  %s75_s20 = smov [#allocation2]  }
   0x3   :  { %v15_v4 = vld [vmem:[%s113_s2] sm:$0xff]  ;;  %s41_s0 = sshll.u32 %s75_s20, 4  ;;  %s42_s0 = int_to_ptr.vmem [resolvable:$true] %s41_s0 }
   0x4   :  { %s52_s1 = scalar_lea.vmem %s42_s0, 256  ;;  %p57_p1 = scmp.lt.s32.totalorder %s42_s0, %s42_s0 }
   0x5   :  { %p53_p0 = scmp.ne.s32.totalorder %s42_s0, %s52_s1  ;;  %p58_p2 = scmp.lt.s32.totalorder %s52_s1, %s52_s1 }
   0x6   :  { %28 = vperm.xlu0 %51, %v25_v2  }
   0x7   :  { %p59_p3 = por %p58_p2, %p57_p1 }
   0x9   :  { %p60_p4 = pnand %p59_p3, %p53_p0 }
  0x7d   :  { %v21_v3 = vpop.permute.xlu0 %20 }
  0x7e   :  { %v23_v6 = vmul.f32 %v21_v3, %v15_v4  ;;  %v24_v7 = vmul.f32 %v21_v3, %v16_v5 }
  0x81   :  { %v29_v8 = vpop.permute.xlu0 %28 }
  0x82   :  { %v31_v9 = vadd.f32 %v29_v8, %v23_v6  ;;  %v32_v10 = vadd.f32 %v29_v8, %v24_v7 }
  0x84   :  { %33 = vst [vmem:[#allocation2] sm:$0xff] %v31_v9  ;;  %34 = vst [vmem:[#allocation2 + $0x8] sm:$0xff] %v32_v10 }
  0x85   :  { %63 = shalt.err (!%p60_p4)
}
  0x86   :  { %44 = dma.vmem_to_hbm [thread:$0]  %s42_s0, 256, %s114_s3, [#allocation3]  }
  0x87   :  { %72 = dma.done.wait [#allocation3], 256  }
  0x88   :  { %73 = vsyncadd [#allocation3], 4294967040 }
  0x89   :  { %48 = vsyncpa [#allocation3], 1 }

</bundles_post_ra>
